<compile_context>
chip_gen: v6e
topology: v6e:2x2x1
jax: 0.10.0
libtpu: 0.0.40
codegen_flags: <defaults>
</compile_context>

<pallas_src>
import functools

import jax
import jax.numpy as jnp
from jax import lax
from jax.experimental import pallas as pl
from jax.experimental.pallas import tpu as pltpu


def _pde_stencil_kernel(scal_ref, f_ref, o_ref, *, n_points, embed_dim,
                        time_steps, dt, pde_type):
    # step_scale = sigmoid(D)*dt/dx^2   (diffusion)
    #            = sigmoid(c)^2*dt/dx^2 (wave)
    step_scale = scal_ref[0, 0]

    N = n_points
    E = embed_dim
    L = N * E

    f = f_ref[...].astype(jnp.float32)          # (Bb, N*E), lane-dense

    # Boundary masks from a single lane iota: lane l = n*E + e.
    lane = lax.broadcasted_iota(jnp.int32, f.shape, 1)
    interior = jnp.logical_and(lane >= E, lane < (N - 1) * E)

    def roll_lanes(x, shift):
        # pltpu.roll is circular; normalize to a positive static shift.
        return pltpu.roll(x, shift=shift % L, axis=1)

    def laplacian(x):
        # lap[l] = x[l+E] + x[l-E] - 2*x[l]; 1/dx^2 is folded into step_scale.
        lap = roll_lanes(x, -E) + roll_lanes(x, E) - 2.0 * x
        lap = jnp.where(interior, lap, 0.0)
        # d2[0] <- d2[1], d2[N-1] <- d2[N-2]: the wrapped-around neighbor of a
        # boundary lane is the opposite boundary lane, which is zero after the
        # mask above, so one add + one select handles both edges.
        return jnp.where(interior, lap,
                         roll_lanes(lap, -E) + roll_lanes(lap, E))

    unroll = max(1, min(int(time_steps), 8))
    if pde_type == "diffusion":
        f = lax.fori_loop(0, time_steps,
                          lambda _, x: x + step_scale * laplacian(x),
                          f, unroll=unroll)
    elif pde_type == "wave":
        dt_f = jnp.float32(dt)

        def body(_, carry):
            x, v = carry
            v = v + step_scale * laplacian(x)
            return x + dt_f * v, v

        f, _ = lax.fori_loop(0, time_steps, body, (f, jnp.zeros_like(f)),
                             unroll=unroll)
    else:
        raise ValueError(f"unsupported pde_type: {pde_type}")

    o_ref[...] = f.astype(o_ref.dtype)


def _choose_batch_block(B, N, E, pde_type):
    """Largest valid batch block under a VMEM byte budget, preferring grid>=4."""
    row_bytes = N * E * 4
    # Double-buffered in + out = 4x tile; wave carries (f, v) live state too.
    tile_budget = (6 << 20) if pde_type == "wave" else (8 << 20)
    max_rows = max(1, tile_budget // row_bytes)
    # Prefer >= 4 grid steps so the BlockSpec pipeline can overlap DMA/compute.
    target = min(max_rows, max(1, B // 4)) if B >= 4 else B
    # Valid Bb: divisor of B with Bb % 8 == 0 (sublane tiling rule) or Bb == B
    # (full-extent exemption).
    valid = [d for d in range(1, B + 1)
             if B % d == 0 and (d % 8 == 0 or d == B)]
    fitting = [d for d in valid if d <= target]
    return max(fitting) if fitting else min(valid)


def pde_field_evolve(field, grid_points, *, diffusion_coeff=0.1, wave_speed=1.0,
                     pde_type="diffusion", time_steps=1, dt=0.01,
                     batch_block=None):
    """Forward pass of PDEFieldEvolver (diffusion / wave branches)."""
    B, N, E = field.shape
    if pde_type not in ("diffusion", "wave"):
        raise NotImplementedError(pde_type)

    if batch_block is None:
        batch_block = _choose_batch_block(B, N, E, pde_type)

    dx = (grid_points[0, 1, 0] - grid_points[0, 0, 0]).astype(jnp.float32)
    if pde_type == "diffusion":
        gate = jax.nn.sigmoid(jnp.asarray(diffusion_coeff, jnp.float32))
        step_scale = gate * jnp.float32(dt) / (dx * dx)
    else:
        c = jax.nn.sigmoid(jnp.asarray(wave_speed, jnp.float32))
        step_scale = c * c * jnp.float32(dt) / (dx * dx)
    scalars = step_scale.reshape(1, 1)

    L = N * E
    field2d = field.reshape(B, L)                 # zero-copy, lane-dense

    kernel = functools.partial(
        _pde_stencil_kernel, n_points=N, embed_dim=E,
        time_steps=int(time_steps), dt=float(dt), pde_type=pde_type)

    out2d = pl.pallas_call(
        kernel,
        out_shape=jax.ShapeDtypeStruct((B, L), field.dtype),
        grid=(B // batch_block,),
        in_specs=[
            pl.BlockSpec(memory_space=pltpu.SMEM),            # [step_scale]
            pl.BlockSpec((batch_block, L), lambda g: (g, 0)),  # field rows
        ],
        out_specs=pl.BlockSpec((batch_block, L), lambda g: (g, 0)),
        compiler_params=pltpu.CompilerParams(
            dimension_semantics=("parallel",),
            vmem_limit_bytes=48 * 1024 * 1024),
    )(scalars, field2d)
    return out2d.reshape(B, N, E)


def reference(field, grid_points, *, diffusion_coeff=0.1, wave_speed=1.0,
              pde_type="diffusion", time_steps=1, dt=0.01):
    """Pure-JAX mirror of the PyTorch forward (kept exactly in torch's order)."""
    dx = grid_points[0, 1, 0] - grid_points[0, 0, 0]

    def lap(f):
        d2 = jnp.zeros_like(f)
        d2 = d2.at[:, 1:-1, :].set(
            (f[:, 2:] - 2.0 * f[:, 1:-1] + f[:, :-2]) / dx ** 2)
        d2 = d2.at[:, 0, :].set(d2[:, 1, :])
        d2 = d2.at[:, -1, :].set(d2[:, -2, :])
        return d2

    f = field
    if pde_type == "diffusion":
        D = jax.nn.sigmoid(jnp.asarray(diffusion_coeff, jnp.float32))
        for _ in range(time_steps):
            f = f + D * dt * lap(f)
        return f
    if pde_type == "wave":
        c = jax.nn.sigmoid(jnp.asarray(wave_speed, jnp.float32))
        v = jnp.zeros_like(f)
        for _ in range(time_steps):
            v = v + c ** 2 * dt * lap(f)
            f = f + dt * v
        return f
    raise NotImplementedError(pde_type)


if __name__ == "__main__":
    B, N, E, P = 2, 16, 4, 2
    key = jax.random.PRNGKey(0)
    field = jax.random.normal(key, (B, N, E), dtype=jnp.float32)
    xs = jnp.linspace(0.0, 1.0, N, dtype=jnp.float32)
    grid_points = jnp.broadcast_to(xs[None, :, None], (B, N, P)).astype(jnp.float32)

    # Diffusion branch (module default).
    out = pde_field_evolve(field, grid_points, diffusion_coeff=0.1,
                           pde_type="diffusion", time_steps=3, dt=0.01)
    out = jax.block_until_ready(out)
    ref = reference(field, grid_points, diffusion_coeff=0.1,
                    pde_type="diffusion", time_steps=3, dt=0.01)
    assert out.shape == (B, N, E)
    assert jnp.allclose(out, ref, atol=1e-4, rtol=1e-4), \
        float(jnp.max(jnp.abs(out - ref)))

    # Wave branch.
    out_w = pde_field_evolve(field, grid_points, wave_speed=1.0,
                             pde_type="wave", time_steps=2, dt=0.01)
    out_w = jax.block_until_ready(out_w)
    ref_w = reference(field, grid_points, wave_speed=1.0,
                      pde_type="wave", time_steps=2, dt=0.01)
    assert jnp.allclose(out_w, ref_w, atol=1e-4, rtol=1e-4), \
        float(jnp.max(jnp.abs(out_w - ref_w)))

    print("KERNEL_OK")
</pallas_src>

<mosaic_0001>
module attributes {stable_mosaic.version = 11 : i64} {
  func.func @_pde_stencil_kernel(%arg0: i32, %arg1: memref<1x1xf32, #tpu.memory_space<smem>>, %arg2: memref<2x64xf32, #tpu.memory_space<vmem>>, %arg3: memref<2x64xf32, #tpu.memory_space<vmem>>) attributes {dimension_semantics = [#tpu.dimension_semantics<parallel>], iteration_bounds = array<i64: 1>, scalar_prefetch = 0 : i64, scratch_operands = 0 : i64, tpu.core_type = #tpu.core_type<tc>, window_params = [{transform_indices = @transform_0, window_bounds = array<i64: 1, 1>}, {transform_indices = @transform_1, window_bounds = array<i64: 2, 64>}, {transform_indices = @transform_2, window_bounds = array<i64: 2, 64>}]} {
    %c0 = arith.constant 0 : index
    %c0_0 = arith.constant 0 : index
    %0 = memref.load %arg1[%c0, %c0_0] : memref<1x1xf32, #tpu.memory_space<smem>>
    %c0_1 = arith.constant 0 : index
    %c0_2 = arith.constant 0 : index
    %1 = vector.load %arg2[%c0_1, %c0_2] : memref<2x64xf32, #tpu.memory_space<vmem>>, vector<2x64xf32>
    %2 = tpu.iota {dimensions = array<i32: 1>} : vector<2x64xi32>
    %c4_i32 = arith.constant 4 : i32
    %3 = vector.broadcast %c4_i32 : i32 to vector<2x64xi32>
    %4 = arith.cmpi sge, %2, %3 : vector<2x64xi32>
    %c60_i32 = arith.constant 60 : i32
    %5 = vector.broadcast %c60_i32 : i32 to vector<2x64xi32>
    %6 = arith.cmpi slt, %2, %5 : vector<2x64xi32>
    %7 = arith.andi %4, %6 : vector<2x64xi1>
    %c0_i32 = arith.constant 0 : i32
    %c60_i32_3 = arith.constant 60 : i32
    %8 = tpu.dynamic_rotate %1 by %c60_i32_3 dim 1 : vector<2x64xf32>, i32 -> vector<2x64xf32>
    %c4_i32_4 = arith.constant 4 : i32
    %9 = tpu.dynamic_rotate %1 by %c4_i32_4 dim 1 : vector<2x64xf32>, i32 -> vector<2x64xf32>
    %10 = arith.addf %8, %9 : vector<2x64xf32>
    %cst = arith.constant 2.000000e+00 : f32
    %11 = vector.broadcast %cst : f32 to vector<2x64xf32>
    %12 = arith.mulf %11, %1 : vector<2x64xf32>
    %13 = arith.subf %10, %12 : vector<2x64xf32>
    %cst_5 = arith.constant 0.000000e+00 : f32
    %14 = vector.broadcast %cst_5 : f32 to vector<2x64xf32>
    %15 = arith.select %7, %13, %14 : vector<2x64xi1>, vector<2x64xf32>
    %c60_i32_6 = arith.constant 60 : i32
    %16 = tpu.dynamic_rotate %15 by %c60_i32_6 dim 1 : vector<2x64xf32>, i32 -> vector<2x64xf32>
    %c4_i32_7 = arith.constant 4 : i32
    %17 = tpu.dynamic_rotate %15 by %c4_i32_7 dim 1 : vector<2x64xf32>, i32 -> vector<2x64xf32>
    %18 = arith.addf %16, %17 : vector<2x64xf32>
    %19 = arith.select %7, %15, %18 : vector<2x64xi1>, vector<2x64xf32>
    %20 = vector.broadcast %0 : f32 to vector<2x64xf32>
    %21 = arith.mulf %20, %19 : vector<2x64xf32>
    %22 = arith.addf %1, %21 : vector<2x64xf32>
    %c1_i32 = arith.constant 1 : i32
    %c60_i32_8 = arith.constant 60 : i32
    %23 = tpu.dynamic_rotate %22 by %c60_i32_8 dim 1 : vector<2x64xf32>, i32 -> vector<2x64xf32>
    %c4_i32_9 = arith.constant 4 : i32
    %24 = tpu.dynamic_rotate %22 by %c4_i32_9 dim 1 : vector<2x64xf32>, i32 -> vector<2x64xf32>
    %25 = arith.addf %23, %24 : vector<2x64xf32>
    %cst_10 = arith.constant 2.000000e+00 : f32
    %26 = vector.broadcast %cst_10 : f32 to vector<2x64xf32>
    %27 = arith.mulf %26, %22 : vector<2x64xf32>
    %28 = arith.subf %25, %27 : vector<2x64xf32>
    %cst_11 = arith.constant 0.000000e+00 : f32
    %29 = vector.broadcast %cst_11 : f32 to vector<2x64xf32>
    %30 = arith.select %7, %28, %29 : vector<2x64xi1>, vector<2x64xf32>
    %c60_i32_12 = arith.constant 60 : i32
    %31 = tpu.dynamic_rotate %30 by %c60_i32_12 dim 1 : vector<2x64xf32>, i32 -> vector<2x64xf32>
    %c4_i32_13 = arith.constant 4 : i32
    %32 = tpu.dynamic_rotate %30 by %c4_i32_13 dim 1 : vector<2x64xf32>, i32 -> vector<2x64xf32>
    %33 = arith.addf %31, %32 : vector<2x64xf32>
    %34 = arith.select %7, %30, %33 : vector<2x64xi1>, vector<2x64xf32>
    %35 = vector.broadcast %0 : f32 to vector<2x64xf32>
    %36 = arith.mulf %35, %34 : vector<2x64xf32>
    %37 = arith.addf %22, %36 : vector<2x64xf32>
    %c2_i32 = arith.constant 2 : i32
    %c60_i32_14 = arith.constant 60 : i32
    %38 = tpu.dynamic_rotate %37 by %c60_i32_14 dim 1 : vector<2x64xf32>, i32 -> vector<2x64xf32>
    %c4_i32_15 = arith.constant 4 : i32
    %39 = tpu.dynamic_rotate %37 by %c4_i32_15 dim 1 : vector<2x64xf32>, i32 -> vector<2x64xf32>
    %40 = arith.addf %38, %39 : vector<2x64xf32>
    %cst_16 = arith.constant 2.000000e+00 : f32
    %41 = vector.broadcast %cst_16 : f32 to vector<2x64xf32>
    %42 = arith.mulf %41, %37 : vector<2x64xf32>
    %43 = arith.subf %40, %42 : vector<2x64xf32>
    %cst_17 = arith.constant 0.000000e+00 : f32
    %44 = vector.broadcast %cst_17 : f32 to vector<2x64xf32>
    %45 = arith.select %7, %43, %44 : vector<2x64xi1>, vector<2x64xf32>
    %c60_i32_18 = arith.constant 60 : i32
    %46 = tpu.dynamic_rotate %45 by %c60_i32_18 dim 1 : vector<2x64xf32>, i32 -> vector<2x64xf32>
    %c4_i32_19 = arith.constant 4 : i32
    %47 = tpu.dynamic_rotate %45 by %c4_i32_19 dim 1 : vector<2x64xf32>, i32 -> vector<2x64xf32>
    %48 = arith.addf %46, %47 : vector<2x64xf32>
    %49 = arith.select %7, %45, %48 : vector<2x64xi1>, vector<2x64xf32>
    %50 = vector.broadcast %0 : f32 to vector<2x64xf32>
    %51 = arith.mulf %50, %49 : vector<2x64xf32>
    %52 = arith.addf %37, %51 : vector<2x64xf32>
    %c0_20 = arith.constant 0 : index
    %c0_21 = arith.constant 0 : index
    %53 = vector.load %arg3[%c0_20, %c0_21] : memref<2x64xf32, #tpu.memory_space<vmem>>, vector<2x64xf32>
    tpu.vector_store %arg3[%c0_20, %c0_21], %52 {strides = array<i32>} : memref<2x64xf32, #tpu.memory_space<vmem>>, vector<2x64xf32>,
    return
  }
  func.func @transform_0(%arg0: i32) -> (i32, i32) {
    %c0_i32 = arith.constant 0 : i32
    %c0_i32_0 = arith.constant 0 : i32
    %c0_i32_1 = arith.constant 0 : i32
    return %c0_i32, %c0_i32_0 : i32, i32
  }
  func.func @transform_1(%arg0: i32) -> (i32, i32) {
    %c0_i32 = arith.constant 0 : i32
    %c0_i32_0 = arith.constant 0 : i32
    return %arg0, %c0_i32 : i32, i32
  }
  func.func @transform_2(%arg0: i32) -> (i32, i32) {
    %c0_i32 = arith.constant 0 : i32
    %c0_i32_0 = arith.constant 0 : i32
    return %arg0, %c0_i32 : i32, i32
  }
}

</mosaic_0001>

<bundles_post_ra>
// kernel: tpu_custom_call.1
= control target key start
LH: loop header
LB: loop body
LE: loop exit
PB: predicated region body
PF: predicated region fallthrough
CT: control target
= control target key end

     0   :  { %s274_s0 = inlined_call_operand.<no memory space> [shape: f32[1,1], index: 0, kind: input, shape index: {}]   ;;  %s275_s1 = inlined_call_operand.vmem [shape: f32[2,64], index: 1, kind: input, shape index: {}]   ;;  %s276_s2 = inlined_call_operand.hbm [shape: f32[2,64], index: 2, kind: output, shape index: {}]  }
   0x1   :  { %v14_v0 = vld [vmem:[%s275_s1] sm:$0x3] }
   0x2   :  { %8 = vsyncpa [#allocation4], 0  ;;  %s185_s11 = smov 64   ;;  %vm20_vm0 = vcmask 1048064   ;;  %s186_s12 = smov 72   ;;  %v32_v5 = vmul.f32 2.0, %v14_v0  ;;  %v15_v10 = vlaneseq  ;;  %v230_v21 = vstv %s274_s0 }
   0x3   :  { %21 = vrot.lane.b32.xlu0 %v14_v0, %s185_s11  ;;  %s187_s13 = smov 4   ;;  %s188_s1 = smov 124   ;;  %vm142_vm4 = vcmask 517120  }
   0x4   :  { %v16_v11 = vand.u32 127, %v15_v10  ;;  %s189_s0 = smov [#allocation3]  }
   0x5   :  { %s150_s16 = sshll.u32 %s189_s0, 4  ;;  %s151_s16 = int_to_ptr.vmem [resolvable:$true] %s150_s16 }
   0x6   :  { %vm17_vm1 = vcmp.ge.s32.totalorder %v16_v11, 4  ;;  %vm18_vm2 = vcmp.lt.s32.totalorder %v16_v11, 60  ;;  %s163_s17 = scalar_lea.vmem %s151_s16, 32  ;;  %p168_p1 = scmp.lt.s32.totalorder %s151_s16, %s151_s16 }
   0x7   :  { %vm215_vm3 = vmand %vm17_vm1, %vm18_vm2  ;;  %p164_p0 = scmp.ne.s32.totalorder %s151_s16, %s163_s17  ;;  %p169_p2 = scmp.lt.s32.totalorder %s163_s17, %s163_s17 }
   0x9   :  { %p170_p3 = por %p169_p2, %p168_p1 }
   0xb   :  { %p171_p4 = pnand %p170_p3, %p164_p0 }
  0x75   :  { %v22_v1 = vpop.permute.xlu0 %21 }
  0x76   :  { %v23_v2 = vsel %vm20_vm0, %v22_v1, %v14_v0 }
  0x77   :  { %24 = vrot.lane.b32.xlu0 %v23_v2, %s185_s11 }
  0xe9   :  { %v25_v3 = vpop.permute.xlu0 %24 }
  0xea   :  { %v26_v4 = vsel %vm20_vm0, %v25_v3, %v14_v0 }
  0xeb   :  { %28 = vrot.lane.b32.xlu1 %v26_v4, %s186_s12 }
  0xef   :  { %34 = vrot.lane.b32.xlu1 %v32_v5, %s187_s13 }
 0x15d   :  { %v29_v6 = vpop.permute.xlu1 %28 }
 0x15e   :  { %v31_v7 = vadd.f32 %v29_v6, %v26_v4 }
 0x161   :  { %v35_v8 = vpop.permute.xlu1 %34 }
 0x162   :  { %v37_v9 = vsub.f32 %v31_v7, %v35_v8 }
 0x164   :  { %39 = vrot.lane.b32.xlu0 %v37_v9, %s188_s1 }
 0x1d6   :  { %v40_v13 = vpop.permute.xlu0 %39 }
 0x1d7   :  { %v42_v14 = vsel %vm215_vm3, %v40_v13, 0.0 }
 0x1d8   :  { %43 = vrot.lane.b32.xlu1 %v42_v14, %s185_s11 }
 0x24a   :  { %v44_v15 = vpop.permute.xlu1 %43 }
 0x24b   :  { %v45_v16 = vsel %vm20_vm0, %v44_v15, %v42_v14 }
 0x24c   :  { %46 = vrot.lane.b32.xlu0 %v45_v16, %s185_s11 }
 0x2be   :  { %v47_v17 = vpop.permute.xlu0 %46 }
 0x2bf   :  { %v48_v18 = vsel %vm20_vm0, %v47_v17, %v42_v14 }
 0x2c0   :  { %50 = vrot.lane.b32.xlu1 %v48_v18, %s186_s12 }
 0x332   :  { %v51_v19 = vpop.permute.xlu1 %50 }
 0x333   :  { %v53_v20 = vadd.f32 %v51_v19, %v48_v18 }
 0x335   :  { %55 = vrot.lane.b32.xlu0 %v53_v20, %s188_s1 }
 0x3a7   :  { %v56_v22 = vpop.permute.xlu0 %55 }
 0x3a8   :  { %v58_v23 = vsel %vm215_vm3, %v40_v13, %v56_v22 }
 0x3a9   :  { %v60_v24 = vmul.f32 %v230_v21, %v58_v23 }
 0x3ab   :  { %v61_v25 = vadd.f32 %v60_v24, %v14_v0 }
 0x3ad   :  { %62 = vrot.lane.b32.xlu1 %v61_v25, %s185_s11  ;;  %v73_v28 = vmul.f32 2.0, %v61_v25 }
 0x41f   :  { %v63_v26 = vpop.permute.xlu1 %62 }
 0x420   :  { %v64_v27 = vsel %vm20_vm0, %v63_v26, %v61_v25 }
 0x421   :  { %65 = vrot.lane.b32.xlu0 %v64_v27, %s185_s11 }
 0x425   :  { %75 = vrot.lane.b32.xlu0 %v73_v28, %s187_s13 }
 0x493   :  { %v66_v29 = vpop.permute.xlu0 %65 }
 0x494   :  { %v67_v30 = vsel %vm20_vm0, %v66_v29, %v61_v25 }
 0x495   :  { %69 = vrot.lane.b32.xlu1 %v67_v30, %s186_s12 }
 0x497   :  { %v76_v33 = vpop.permute.xlu0 %75 }
 0x507   :  { %v70_v31 = vpop.permute.xlu1 %69 }
 0x508   :  { %v72_v32 = vadd.f32 %v70_v31, %v67_v30 }
 0x50a   :  { %v78_v34 = vsub.f32 %v72_v32, %v76_v33 }
 0x50c   :  { %80 = vrot.lane.b32.xlu1 %v78_v34, %s188_s1 }
 0x57e   :  { %v81_v35 = vpop.permute.xlu1 %80 }
 0x57f   :  { %v83_v36 = vsel %vm215_vm3, %v81_v35, 0.0 }
 0x580   :  { %84 = vrot.lane.b32.xlu0 %v83_v36, %s185_s11 }
 0x5f2   :  { %v85_v37 = vpop.permute.xlu0 %84 }
 0x5f3   :  { %v86_v38 = vsel %vm20_vm0, %v85_v37, %v83_v36 }
 0x5f4   :  { %87 = vrot.lane.b32.xlu1 %v86_v38, %s185_s11 }
 0x666   :  { %v88_v39 = vpop.permute.xlu1 %87 }
 0x667   :  { %v89_v40 = vsel %vm20_vm0, %v88_v39, %v83_v36 }
 0x668   :  { %91 = vrot.lane.b32.xlu0 %v89_v40, %s186_s12 }
 0x6da   :  { %v92_v41 = vpop.permute.xlu0 %91 }
 0x6db   :  { %v94_v42 = vadd.f32 %v92_v41, %v89_v40 }
 0x6dd   :  { %96 = vrot.lane.b32.xlu1 %v94_v42, %s188_s1 }
 0x74f   :  { %v97_v43 = vpop.permute.xlu1 %96 }
 0x750   :  { %v99_v44 = vsel %vm215_vm3, %v81_v35, %v97_v43 }
 0x751   :  { %v100_v45 = vmul.f32 %v99_v44, %v230_v21 }
 0x753   :  { %v101_v46 = vadd.f32 %v100_v45, %v61_v25 }
 0x755   :  { %102 = vrot.lane.b32.xlu0 %v101_v46, %s185_s11  ;;  %v113_v49 = vmul.f32 2.0, %v101_v46 }
 0x7c7   :  { %v103_v47 = vpop.permute.xlu0 %102 }
 0x7c8   :  { %v104_v48 = vsel %vm20_vm0, %v103_v47, %v101_v46 }
 0x7c9   :  { %105 = vrot.lane.b32.xlu1 %v104_v48, %s185_s11 }
 0x7cd   :  { %115 = vrot.lane.b32.xlu1 %v113_v49, %s187_s13 }
 0x83b   :  { %v106_v50 = vpop.permute.xlu1 %105 }
 0x83c   :  { %v107_v51 = vsel %vm20_vm0, %v106_v50, %v101_v46 }
 0x83d   :  { %109 = vrot.lane.b32.xlu0 %v107_v51, %s186_s12 }
 0x83f   :  { %v116_v54 = vpop.permute.xlu1 %115 }
 0x8af   :  { %v110_v52 = vpop.permute.xlu0 %109 }
 0x8b0   :  { %v112_v53 = vadd.f32 %v110_v52, %v107_v51 }
 0x8b2   :  { %v118_v55 = vsub.f32 %v112_v53, %v116_v54 }
 0x8b4   :  { %120 = vrot.lane.b32.xlu0 %v118_v55, %s188_s1 }
 0x926   :  { %v121_v56 = vpop.permute.xlu0 %120 }
 0x927   :  { %v123_v57 = vsel %vm215_vm3, %v121_v56, 0.0 }
 0x928   :  { %124 = vrot.lane.b32.xlu1 %v123_v57, %s185_s11 }
 0x99a   :  { %v125_v58 = vpop.permute.xlu1 %124 }
 0x99b   :  { %v126_v59 = vsel %vm20_vm0, %v125_v58, %v123_v57 }
 0x99c   :  { %127 = vrot.lane.b32.xlu0 %v126_v59, %s185_s11 }
 0xa0e   :  { %v128_v60 = vpop.permute.xlu0 %127 }
 0xa0f   :  { %v129_v61 = vsel %vm20_vm0, %v128_v60, %v123_v57 }
 0xa10   :  { %131 = vrot.lane.b32.xlu1 %v129_v61, %s186_s12 }
 0xa82   :  { %v132_v62 = vpop.permute.xlu1 %131 }
 0xa83   :  { %v134_v63 = vadd.f32 %v132_v62, %v129_v61 }
 0xa85   :  { %136 = vrot.lane.b32.xlu0 %v134_v63, %s188_s1 }
 0xaf7   :  { %v137_v0 = vpop.permute.xlu0 %136 }
 0xaf8   :  { %v139_v1 = vsel %vm215_vm3, %v121_v56, %v137_v0 }
 0xaf9   :  { %v140_v2 = vmul.f32 %v139_v1, %v230_v21 }
 0xafb   :  { %v141_v3 = vadd.f32 %v140_v2, %v101_v46 }
 0xafd   :  { %143 = vst.msk [vmem:[#allocation3] sm:$0x3] %vm142_vm4, %v141_v3 }
 0xafe   :  { %174 = shalt.err (!%p171_p4)
}
 0xaff   :  { %153 = dma.vmem_to_hbm [thread:$0]  %s151_s16, 32, %s276_s2, [#allocation4]  }
 0xb00   :  { %183 = dma.done.wait [#allocation4], 32  }
 0xb01   :  { %184 = vsyncadd [#allocation4], 4294967264 }
 0xb02   :  { %157 = vsyncpa [#allocation4], 1 }

</bundles_post_ra>
